<compile_context>
chip_gen: v7x
topology: tpu7x:2x2x1
jax: 0.10.0
libtpu: 0.0.40
codegen_flags: <defaults>
</compile_context>

<pallas_src>
import functools
import math

import jax
import jax.numpy as jnp
from jax.experimental import pallas as pl
from jax.experimental.pallas import tpu as pltpu


def _round_up(v, m):
    return ((v + m - 1) // m) * m


def _vmem_capacity_bytes():
    try:
        return int(pltpu.get_tpu_info().vmem_capacity_bytes)
    except Exception:
        return 64 << 20  # conservative fallback (v7x per-TC VMEM)


# Flipped to False if the installed JAX rejects pipeline_mode=pl.Buffered(1).
_SINGLE_BUFFER_WEIGHTS = True


# ----------------------------------------------------------------------------
# Fused GRU-cell kernel
# ----------------------------------------------------------------------------
def _gru_cell_kernel(x_ref, h_ref, gxg_ref, m_ref, wx_ref, wh_ref, bu_ref,
                     out_ref, *, hp, h_dim, mm_dtype):
    x = x_ref[0]            # (tile_t, x_feat)  input features (without g)
    h = h_ref[0]            # (tile_t, h_dim)

    # Two wide matmuls on the MXU (bf16 operands, f32 accumulate).
    # gx columns: [r | z | c], gh columns: [r | z | u]; the g contribution and
    # the r/z/c biases arrive pre-reduced as a (1, 3*hp) row (gxg).
    gx = jnp.dot(x.astype(mm_dtype), wx_ref[...],
                 preferred_element_type=jnp.float32) + gxg_ref[0]
    gh = jnp.dot(h.astype(mm_dtype), wh_ref[...],
                 preferred_element_type=jnp.float32)

    r = jax.nn.sigmoid(gx[:, :hp] + gh[:, :hp])
    z = jax.nn.sigmoid(gx[:, hp:2 * hp] + gh[:, hp:2 * hp])
    # bu only matters in the u column -> add it to that slice alone.
    u = jnp.tanh(gx[:, 2 * hp:] + r * (gh[:, 2 * hp:] + bu_ref[...]))

    hf = h.astype(jnp.float32)
    # z*h + (1-z)*u == u + z*(h - u): one fewer multiply per element.
    new_h = u[:, :h_dim] + z[:, :h_dim] * (hf - u[:, :h_dim])
    # Fused masking epilogue (mask is (tile_t, 1), broadcast over features).
    out_ref[0] = (new_h * m_ref[0]).astype(out_ref.dtype)


def _estimate_vmem(tile_t, xf, hd, hp, act_isz, w_isz, w_bufs):
    n3 = 3 * hp
    weights = w_bufs * (xf + hd) * n3 * w_isz + 2 * hp * 4
    acts = 2 * tile_t * (xf + 2 * hd + 1) * act_isz + 2 * n3 * 4
    temps = tile_t * (2 * n3 + 4 * hp) * 4
    return weights + acts + temps + (2 << 20)


def gru_cell_pallas(x, h, g, mask, packed):
    """x: [B, T, x_feat], h: [B, T, h_dim], g: [B, g_dim], mask: [B, T]
       -> masked new_h: [B, T, h_dim]."""
    global _SINGLE_BUFFER_WEIGHTS

    B, T, xf = x.shape
    hd = h.shape[-1]
    hp = packed["hp"]
    n3 = 3 * hp
    mm_dtype = packed["wx"].dtype
    assert xf == packed["xf"] and hd == packed["h_dim"]

    # g's contribution + r/z/c biases: a tiny (B, 1, 3*hp) row computed once
    # outside the kernel -> no B*T*g_dim broadcast or concat ever hits HBM.
    gxg = (jnp.dot(g.astype(mm_dtype), packed["wg"],
                   preferred_element_type=jnp.float32)
           + packed["bx"]).reshape(B, 1, n3).astype(jnp.float32)
    maskf = mask.astype(jnp.float32).reshape(B, T, 1)

    cap = int(0.85 * _vmem_capacity_bytes())
    # Row tile: whole T when small (block == full dim is always legal),
    # otherwise up to 512 rows (multiple of 8); shrink if VMEM estimate blows.
    tile_t = T if T <= 512 else 512
    while tile_t > 8 and _estimate_vmem(tile_t, xf, hd, hp, x.dtype.itemsize,
                                        mm_dtype.itemsize, 2) > cap:
        tile_t = max(8, (tile_t // 2 // 8) * 8)

    grid = (B, pl.cdiv(T, tile_t))

    def _const_spec(shape, single_buffer):
        zero = (0,) * len(shape)
        if single_buffer:
            return pl.BlockSpec(shape, lambda b, t: zero,
                                pipeline_mode=pl.Buffered(1))
        return pl.BlockSpec(shape, lambda b, t: zero)

    def run(single_buffer):
        in_specs = [
            pl.BlockSpec((1, tile_t, xf), lambda b, t: (b, t, 0)),
            pl.BlockSpec((1, tile_t, hd), lambda b, t: (b, t, 0)),
            pl.BlockSpec((1, 1, n3), lambda b, t: (b, 0, 0)),
            pl.BlockSpec((1, tile_t, 1), lambda b, t: (b, t, 0)),
            _const_spec((xf, n3), single_buffer),   # Wx  (VMEM-resident)
            _const_spec((hd, n3), single_buffer),   # Wh  (VMEM-resident)
            _const_spec((1, hp), single_buffer),    # bu
        ]
        est = _estimate_vmem(tile_t, xf, hd, hp, x.dtype.itemsize,
                             mm_dtype.itemsize, 1 if single_buffer else 2)
        vmem_limit = int(min(max(est, 32 << 20), cap))
        return pl.pallas_call(
            functools.partial(_gru_cell_kernel, hp=hp, h_dim=hd,
                              mm_dtype=mm_dtype),
            out_shape=jax.ShapeDtypeStruct((B, T, hd), x.dtype),
            grid=grid,
            in_specs=in_specs,
            out_specs=pl.BlockSpec((1, tile_t, hd), lambda b, t: (b, t, 0)),
            compiler_params=pltpu.CompilerParams(
                dimension_semantics=("parallel", "parallel"),
                vmem_limit_bytes=vmem_limit,
            ),
        )(x, h, gxg, maskf, packed["wx"], packed["wh"], packed["bu"])

    if _SINGLE_BUFFER_WEIGHTS:
        try:
            return run(single_buffer=True)
        except Exception:
            _SINGLE_BUFFER_WEIGHTS = False
    return run(single_buffer=False)


# ----------------------------------------------------------------------------
# Parameter init (PyTorch nn.Linear default) + packing into fused slabs
# ----------------------------------------------------------------------------
def init_gru_raw(key, x_dim, h_dim, dtype=jnp.float32):
    """Weights stored pre-transposed as (in, out)."""
    ks = jax.random.split(key, 8)

    def linear(kw, kb, fan_in, fan_out):
        bound = 1.0 / math.sqrt(fan_in)
        w = jax.random.uniform(kw, (fan_in, fan_out), dtype, -bound, bound)
        b = jax.random.uniform(kb, (1, fan_out), dtype, -bound, bound)
        return w, b

    wr, br = linear(ks[0], ks[1], x_dim + h_dim, h_dim)
    wz, bz = linear(ks[2], ks[3], x_dim + h_dim, h_dim)
    wc, bc = linear(ks[4], ks[5], x_dim, h_dim)
    wu, bu = linear(ks[6], ks[7], h_dim, h_dim)
    return dict(wr=wr, br=br, wz=wz, bz=bz, wc=wc, bc=bc, wu=wu, bu=bu,
                x_dim=x_dim, h_dim=h_dim)


def pack_gru_params(raw, g_dim, matmul_dtype=jnp.bfloat16):
    """Split r/z/c weights into (input-features | g | h) parts and fuse into
    [r | z | c-or-u] column slabs, each column block zero-padded to hp."""
    x_dim, h_dim = raw["x_dim"], raw["h_dim"]
    xf = x_dim - g_dim                       # features coming from si/ei
    hp = _round_up(h_dim, 128)
    # Note: kept at 128-multiples; padding to 256 for v6e/v7x MXU alignment is
    # skipped since it would inflate padding a lot at small/medium h_dim.

    def col_pad(w):                          # (in, h_dim) -> (in, hp)
        return jnp.pad(w, ((0, 0), (0, hp - h_dim)))

    wr, wz, wc, wu = raw["wr"], raw["wz"], raw["wc"], raw["wu"]
    wx = jnp.concatenate([col_pad(wr[:xf]), col_pad(wz[:xf]),
                          col_pad(wc[:xf])], axis=1)
    wg = jnp.concatenate([col_pad(wr[xf:x_dim]), col_pad(wz[xf:x_dim]),
                          col_pad(wc[xf:])], axis=1)
    wh = jnp.concatenate([col_pad(wr[x_dim:]), col_pad(wz[x_dim:]),
                          col_pad(wu)], axis=1)

    def pad_b(b):
        return jnp.pad(b, ((0, 0), (0, hp - h_dim)))

    bx = jnp.concatenate([pad_b(raw["br"]), pad_b(raw["bz"]),
                          pad_b(raw["bc"])], axis=1)

    return dict(wx=wx.astype(matmul_dtype), wg=wg.astype(matmul_dtype),
                wh=wh.astype(matmul_dtype),
                bx=bx.astype(jnp.float32),
                bu=pad_b(raw["bu"]).astype(jnp.float32),
                hp=hp, xf=xf, h_dim=h_dim)


def init_sgru(key, s_emb, e_emb, sh_dim, eh_dim, label_dim,
              matmul_dtype=jnp.bfloat16):
    g_dim = sh_dim
    ks = jax.random.split(key, 3)
    raw = dict(
        s=init_gru_raw(ks[0], s_emb + sh_dim + label_dim + eh_dim + g_dim, sh_dim),
        e=init_gru_raw(ks[1], e_emb + sh_dim + label_dim + g_dim, eh_dim),
        g=init_gru_raw(ks[2], sh_dim + eh_dim, g_dim),
    )
    packed = dict(
        s=pack_gru_params(raw["s"], g_dim, matmul_dtype),
        e=pack_gru_params(raw["e"], g_dim, matmul_dtype),
    )
    return raw, packed


# ----------------------------------------------------------------------------
# Pure-JAX GRU cell (used as reference and for the tiny g-branch)
# ----------------------------------------------------------------------------
def gru_cell_ref(x, h, raw):
    xh = jnp.concatenate([x, h], -1)
    r = jax.nn.sigmoid(xh @ raw["wr"] + raw["br"])
    z = jax.nn.sigmoid(xh @ raw["wz"] + raw["bz"])
    u = jnp.tanh(x @ raw["wc"] + raw["bc"] + r * (h @ raw["wu"] + raw["bu"]))
    return z * h + (1.0 - z) * u


# ----------------------------------------------------------------------------
# SGRU forward (Pallas GRU cells for the s/e branches, plain-JAX glue)
# ----------------------------------------------------------------------------
def sgru_forward_pallas(raw, packed, it, h, g, mask):
    si, ei = it
    sh, eh = h
    smask, wmask = mask

    # new_sh / new_eh come out of the kernel already masked.
    new_sh = gru_cell_pallas(si, sh, g, smask, packed["s"])
    new_eh = gru_cell_pallas(ei, eh, g, wmask, packed["e"])

    sh_mean = new_sh.sum(1) / smask.astype(new_sh.dtype).sum(1, keepdims=True)
    eh_mean = new_eh.sum(1) / (wmask.astype(new_eh.dtype).sum(1, keepdims=True) + 1.0)
    mean = jnp.concatenate([sh_mean, eh_mean], -1)

    # g-branch has only B rows: plain JAX (Pallas launch would be pure overhead).
    new_g = gru_cell_ref(mean, g, raw["g"])
    return new_sh, new_eh, new_g


# ----------------------------------------------------------------------------
# Pure-JAX reference matching the PyTorch forward exactly
# ----------------------------------------------------------------------------
def sgru_forward_ref(raw, it, h, g, mask):
    si, ei = it
    sh, eh = h
    smask, wmask = mask
    B, T, _ = si.shape
    Te = ei.shape[1]
    g_dim = g.shape[-1]

    g_s = jnp.broadcast_to(g[:, None, :], (B, T, g_dim))
    x_s = jnp.concatenate([si, g_s], -1).reshape(B * T, -1)
    new_sh = gru_cell_ref(x_s, sh.reshape(B * T, -1), raw["s"]).reshape(B, T, -1)

    g_e = jnp.broadcast_to(g[:, None, :], (B, Te, g_dim))
    x_e = jnp.concatenate([ei, g_e], -1).reshape(B * Te, -1)
    new_eh = gru_cell_ref(x_e, eh.reshape(B * Te, -1), raw["e"]).reshape(B, Te, -1)

    new_sh = jnp.where((smask == 0)[..., None], 0.0, new_sh)
    new_eh = jnp.where((wmask == 0)[..., None], 0.0, new_eh)
    sh_mean = new_sh.sum(1) / smask.astype(new_sh.dtype).sum(1, keepdims=True)
    eh_mean = new_eh.sum(1) / (wmask.astype(new_eh.dtype).sum(1, keepdims=True) + 1.0)
    mean = jnp.concatenate([sh_mean, eh_mean], -1)
    new_g = gru_cell_ref(mean, g, raw["g"])
    return new_sh, new_eh, new_g


if __name__ == "__main__":
    S_EMB, E_EMB, SH_DIM, EH_DIM, LABEL_DIM = 8, 6, 16, 12, 4
    G_DIM = SH_DIM
    B, T_S, T_E = 2, 6, 5

    key = jax.random.PRNGKey(0)
    k_par, k_si, k_ei, k_sh, k_eh, k_g = jax.random.split(key, 6)

    # f32-packed params (exact validation mode) + bf16-packed (fast default).
    raw, packed_f32 = init_sgru(k_par, S_EMB, E_EMB, SH_DIM, EH_DIM, LABEL_DIM,
                                matmul_dtype=jnp.float32)
    packed_bf16 = {k: pack_gru_params(raw[k], G_DIM, jnp.bfloat16)
                   for k in ("s", "e")}

    # Widths implied by the forward: cat(si, g) must match s_gru's x_dim, etc.
    si_dim = S_EMB + SH_DIM + LABEL_DIM + EH_DIM
    ei_dim = E_EMB + SH_DIM + LABEL_DIM

    si = jax.random.normal(k_si, (B, T_S, si_dim), jnp.float32)
    ei = jax.random.normal(k_ei, (B, T_E, ei_dim), jnp.float32)
    sh = jax.random.normal(k_sh, (B, T_S, SH_DIM), jnp.float32)
    eh = jax.random.normal(k_eh, (B, T_E, EH_DIM), jnp.float32)
    g = jax.random.normal(k_g, (B, G_DIM), jnp.float32)

    smask = jnp.array([[1, 1, 1, 1, 1, 1],
                       [1, 1, 1, 1, 0, 0]], jnp.int32)
    wmask = jnp.array([[1, 1, 1, 1, 1],
                       [1, 1, 1, 0, 0]], jnp.int32)

    args = ((si, ei), (sh, eh), g, (smask, wmask))

    out_f32 = jax.block_until_ready(sgru_forward_pallas(raw, packed_f32, *args))
    out_bf16 = jax.block_until_ready(sgru_forward_pallas(raw, packed_bf16, *args))
    ref = sgru_forward_ref(raw, *args)

    assert out_bf16[0].shape == (B, T_S, SH_DIM)
    assert out_bf16[1].shape == (B, T_E, EH_DIM)
    assert out_bf16[2].shape == (B, G_DIM)

    # f32 matmul path: tight check against the exact reference.
    for got, want in zip(out_f32, ref):
        assert jnp.allclose(got, want, atol=1e-4, rtol=1e-4), "f32 mismatch"
    # bf16 matmul operands (f32 accumulate + f32 gate math): loose check.
    for got, want in zip(out_bf16, ref):
        assert jnp.allclose(got, want, atol=5e-2, rtol=5e-2), "bf16 mismatch"

    print("KERNEL_OK")
</pallas_src>

<mosaic_0001>
module attributes {stable_mosaic.version = 11 : i64} {
  func.func @_gru_cell_kernel(%arg0: i32, %arg1: i32, %arg2: memref<1x6x40xf32, #tpu.memory_space<vmem>>, %arg3: memref<1x6x16xf32, #tpu.memory_space<vmem>>, %arg4: memref<1x1x384xf32, #tpu.memory_space<vmem>>, %arg5: memref<1x6x1xf32, #tpu.memory_space<vmem>>, %arg6: memref<40x384xf32, #tpu.memory_space<vmem>>, %arg7: memref<16x384xf32, #tpu.memory_space<vmem>>, %arg8: memref<1x128xf32, #tpu.memory_space<vmem>>, %arg9: memref<1x6x16xf32, #tpu.memory_space<vmem>>) attributes {dimension_semantics = [#tpu.dimension_semantics<parallel>, #tpu.dimension_semantics<parallel>], iteration_bounds = array<i64: 2, 1>, scalar_prefetch = 0 : i64, scratch_operands = 0 : i64, tpu.core_type = #tpu.core_type<tc>, window_params = [{transform_indices = @transform_0, window_bounds = array<i64: 1, 6, 40>}, {transform_indices = @transform_1, window_bounds = array<i64: 1, 6, 16>}, {transform_indices = @transform_2, window_bounds = array<i64: 1, 1, 384>}, {transform_indices = @transform_3, window_bounds = array<i64: 1, 6, 1>}, {pipeline_mode = #tpu.pipeline_mode<synchronous>, transform_indices = @transform_4, window_bounds = array<i64: 40, 384>}, {pipeline_mode = #tpu.pipeline_mode<synchronous>, transform_indices = @transform_5, window_bounds = array<i64: 16, 384>}, {pipeline_mode = #tpu.pipeline_mode<synchronous>, transform_indices = @transform_6, window_bounds = array<i64: 1, 128>}, {transform_indices = @transform_7, window_bounds = array<i64: 1, 6, 16>}]} {
    %c0 = arith.constant 0 : index
    %c0_0 = arith.constant 0 : index
    %c0_1 = arith.constant 0 : index
    %0 = vector.load %arg2[%c0, %c0_0, %c0_1] : memref<1x6x40xf32, #tpu.memory_space<vmem>>, vector<1x6x40xf32>
    %1 = vector.shape_cast %0 : vector<1x6x40xf32> to vector<6x40xf32>
    %c0_2 = arith.constant 0 : index
    %c0_3 = arith.constant 0 : index
    %c0_4 = arith.constant 0 : index
    %2 = vector.load %arg3[%c0_2, %c0_3, %c0_4] : memref<1x6x16xf32, #tpu.memory_space<vmem>>, vector<1x6x16xf32>
    %3 = vector.shape_cast %2 : vector<1x6x16xf32> to vector<6x16xf32>
    %c0_5 = arith.constant 0 : index
    %c0_6 = arith.constant 0 : index
    %4 = vector.load %arg6[%c0_5, %c0_6] : memref<40x384xf32, #tpu.memory_space<vmem>>, vector<40x384xf32>
    %cst = arith.constant dense<0.000000e+00> : vector<6x384xf32>
    %5 = tpu.matmul %1, %4, %cst {dimension_numbers = #tpu.dot_dimension_numbers<[1], [0], [0], [1], [0, 0, 1, 1], [], []>} : vector<6x40xf32>, vector<40x384xf32>, vector<6x384xf32> -> vector<6x384xf32>
    %c0_7 = arith.constant 0 : index
    %c0_8 = arith.constant 0 : index
    %c0_9 = arith.constant 0 : index
    %6 = vector.load %arg4[%c0_7, %c0_8, %c0_9] : memref<1x1x384xf32, #tpu.memory_space<vmem>>, vector<1x1x384xf32>
    %7 = vector.shape_cast %6 : vector<1x1x384xf32> to vector<1x384xf32>
    %8 = vector.broadcast %7 : vector<1x384xf32> to vector<6x384xf32>
    %9 = arith.addf %5, %8 : vector<6x384xf32>
    %c0_10 = arith.constant 0 : index
    %c0_11 = arith.constant 0 : index
    %10 = vector.load %arg7[%c0_10, %c0_11] : memref<16x384xf32, #tpu.memory_space<vmem>>, vector<16x384xf32>
    %cst_12 = arith.constant dense<0.000000e+00> : vector<6x384xf32>
    %11 = tpu.matmul %3, %10, %cst_12 {dimension_numbers = #tpu.dot_dimension_numbers<[1], [0], [0], [1], [0, 0, 1, 1], [], []>} : vector<6x16xf32>, vector<16x384xf32>, vector<6x384xf32> -> vector<6x384xf32>
    %12 = vector.extract_strided_slice %9 {offsets = [0, 0], sizes = [6, 128], strides = [1, 1]} : vector<6x384xf32> to vector<6x128xf32>
    %13 = vector.extract_strided_slice %11 {offsets = [0, 0], sizes = [6, 128], strides = [1, 1]} : vector<6x384xf32> to vector<6x128xf32>
    %14 = arith.addf %12, %13 : vector<6x128xf32>
    %15 = arith.negf %14 : vector<6x128xf32>
    %16 = math.exp %15 : vector<6x128xf32>
    %cst_13 = arith.constant 1.000000e+00 : f32
    %17 = vector.broadcast %cst_13 : f32 to vector<6x128xf32>
    %18 = arith.addf %17, %16 : vector<6x128xf32>
    %19 = arith.divf %17, %18 : vector<6x128xf32>
    %20 = vector.extract_strided_slice %9 {offsets = [0, 128], sizes = [6, 128], strides = [1, 1]} : vector<6x384xf32> to vector<6x128xf32>
    %21 = vector.extract_strided_slice %11 {offsets = [0, 128], sizes = [6, 128], strides = [1, 1]} : vector<6x384xf32> to vector<6x128xf32>
    %22 = arith.addf %20, %21 : vector<6x128xf32>
    %23 = arith.negf %22 : vector<6x128xf32>
    %24 = math.exp %23 : vector<6x128xf32>
    %cst_14 = arith.constant 1.000000e+00 : f32
    %25 = vector.broadcast %cst_14 : f32 to vector<6x128xf32>
    %26 = arith.addf %25, %24 : vector<6x128xf32>
    %27 = arith.divf %25, %26 : vector<6x128xf32>
    %28 = vector.extract_strided_slice %9 {offsets = [0, 256], sizes = [6, 128], strides = [1, 1]} : vector<6x384xf32> to vector<6x128xf32>
    %29 = vector.extract_strided_slice %11 {offsets = [0, 256], sizes = [6, 128], strides = [1, 1]} : vector<6x384xf32> to vector<6x128xf32>
    %c0_15 = arith.constant 0 : index
    %c0_16 = arith.constant 0 : index
    %30 = vector.load %arg8[%c0_15, %c0_16] : memref<1x128xf32, #tpu.memory_space<vmem>>, vector<1x128xf32>
    %31 = vector.broadcast %30 : vector<1x128xf32> to vector<6x128xf32>
    %32 = arith.addf %29, %31 : vector<6x128xf32>
    %33 = arith.mulf %19, %32 : vector<6x128xf32>
    %34 = arith.addf %28, %33 : vector<6x128xf32>
    %35 = math.tanh %34 : vector<6x128xf32>
    %36 = vector.extract_strided_slice %35 {offsets = [0, 0], sizes = [6, 16], strides = [1, 1]} : vector<6x128xf32> to vector<6x16xf32>
    %37 = vector.extract_strided_slice %27 {offsets = [0, 0], sizes = [6, 16], strides = [1, 1]} : vector<6x128xf32> to vector<6x16xf32>
    %38 = vector.extract_strided_slice %35 {offsets = [0, 0], sizes = [6, 16], strides = [1, 1]} : vector<6x128xf32> to vector<6x16xf32>
    %39 = arith.subf %3, %38 : vector<6x16xf32>
    %40 = arith.mulf %37, %39 : vector<6x16xf32>
    %41 = arith.addf %36, %40 : vector<6x16xf32>
    %c0_17 = arith.constant 0 : index
    %c0_18 = arith.constant 0 : index
    %c0_19 = arith.constant 0 : index
    %42 = vector.load %arg5[%c0_17, %c0_18, %c0_19] : memref<1x6x1xf32, #tpu.memory_space<vmem>>, vector<1x6x1xf32>
    %43 = vector.shape_cast %42 : vector<1x6x1xf32> to vector<6x1xf32>
    %44 = vector.broadcast %43 : vector<6x1xf32> to vector<6x16xf32>
    %45 = arith.mulf %41, %44 : vector<6x16xf32>
    %c0_20 = arith.constant 0 : index
    %c0_21 = arith.constant 0 : index
    %c0_22 = arith.constant 0 : index
    %46 = vector.load %arg9[%c0_20, %c0_21, %c0_22] : memref<1x6x16xf32, #tpu.memory_space<vmem>>, vector<1x6x16xf32>
    %47 = vector.shape_cast %46 : vector<1x6x16xf32> to vector<6x16xf32>
    %48 = vector.shape_cast %45 : vector<6x16xf32> to vector<1x6x16xf32>
    tpu.vector_store %arg9[%c0_20, %c0_21, %c0_22], %48 {strides = array<i32>} : memref<1x6x16xf32, #tpu.memory_space<vmem>>, vector<1x6x16xf32>,
    return
  }
  func.func @transform_0(%arg0: i32, %arg1: i32) -> (i32, i32, i32) {
    %c0_i32 = arith.constant 0 : i32
    %c0_i32_0 = arith.constant 0 : i32
    return %arg0, %arg1, %c0_i32 : i32, i32, i32
  }
  func.func @transform_1(%arg0: i32, %arg1: i32) -> (i32, i32, i32) {
    %c0_i32 = arith.constant 0 : i32
    %c0_i32_0 = arith.constant 0 : i32
    return %arg0, %arg1, %c0_i32 : i32, i32, i32
  }
  func.func @transform_2(%arg0: i32, %arg1: i32) -> (i32, i32, i32) {
    %c0_i32 = arith.constant 0 : i32
    %c0_i32_0 = arith.constant 0 : i32
    %c0_i32_1 = arith.constant 0 : i32
    return %arg0, %c0_i32, %c0_i32_0 : i32, i32, i32
  }
  func.func @transform_3(%arg0: i32, %arg1: i32) -> (i32, i32, i32) {
    %c0_i32 = arith.constant 0 : i32
    %c0_i32_0 = arith.constant 0 : i32
    return %arg0, %arg1, %c0_i32 : i32, i32, i32
  }
  func.func @transform_4(%arg0: i32, %arg1: i32) -> (i32, i32) {
    %c0_i32 = arith.constant 0 : i32
    %c0_i32_0 = arith.constant 0 : i32
    %c0_i32_1 = arith.constant 0 : i32
    return %c0_i32, %c0_i32_0 : i32, i32
  }
  func.func @transform_5(%arg0: i32, %arg1: i32) -> (i32, i32) {
    %c0_i32 = arith.constant 0 : i32
    %c0_i32_0 = arith.constant 0 : i32
    %c0_i32_1 = arith.constant 0 : i32
    return %c0_i32, %c0_i32_0 : i32, i32
  }
  func.func @transform_6(%arg0: i32, %arg1: i32) -> (i32, i32) {
    %c0_i32 = arith.constant 0 : i32
    %c0_i32_0 = arith.constant 0 : i32
    %c0_i32_1 = arith.constant 0 : i32
    return %c0_i32, %c0_i32_0 : i32, i32
  }
  func.func @transform_7(%arg0: i32, %arg1: i32) -> (i32, i32, i32) {
    %c0_i32 = arith.constant 0 : i32
    %c0_i32_0 = arith.constant 0 : i32
    return %arg0, %arg1, %c0_i32 : i32, i32, i32
  }
}

module attributes {stable_mosaic.version = 11 : i64} {
  func.func @_gru_cell_kernel(%arg0: i32, %arg1: i32, %arg2: memref<1x6x40xf32, #tpu.memory_space<vmem>>, %arg3: memref<1x6x16xf32, #tpu.memory_space<vmem>>, %arg4: memref<1x1x384xf32, #tpu.memory_space<vmem>>, %arg5: memref<1x6x1xf32, #tpu.memory_space<vmem>>, %arg6: memref<40x384xf32, #tpu.memory_space<vmem>>, %arg7: memref<16x384xf32, #tpu.memory_space<vmem>>, %arg8: memref<1x128xf32, #tpu.memory_space<vmem>>, %arg9: memref<1x6x16xf32, #tpu.memory_space<vmem>>) attributes {dimension_semantics = [#tpu.dimension_semantics<parallel>, #tpu.dimension_semantics<parallel>], iteration_bounds = array<i64: 2, 1>, scalar_prefetch = 0 : i64, scratch_operands = 0 : i64, tpu.core_type = #tpu.core_type<tc>, window_params = [{transform_indices = @transform_0, window_bounds = array<i64: 1, 6, 40>}, {transform_indices = @transform_1, window_bounds = array<i64: 1, 6, 16>}, {transform_indices = @transform_2, window_bounds = array<i64: 1, 1, 384>}, {transform_indices = @transform_3, window_bounds = array<i64: 1, 6, 1>}, {pipeline_mode = #tpu.pipeline_mode<synchronous>, transform_indices = @transform_4, window_bounds = array<i64: 40, 384>}, {pipeline_mode = #tpu.pipeline_mode<synchronous>, transform_indices = @transform_5, window_bounds = array<i64: 16, 384>}, {pipeline_mode = #tpu.pipeline_mode<synchronous>, transform_indices = @transform_6, window_bounds = array<i64: 1, 128>}, {transform_indices = @transform_7, window_bounds = array<i64: 1, 6, 16>}]} {
    %c0 = arith.constant 0 : index
    %c0_0 = arith.constant 0 : index
    %c0_1 = arith.constant 0 : index
    %0 = vector.load %arg2[%c0, %c0_0, %c0_1] : memref<1x6x40xf32, #tpu.memory_space<vmem>>, vector<1x6x40xf32>
    %1 = vector.shape_cast %0 : vector<1x6x40xf32> to vector<6x40xf32>
    %c0_2 = arith.constant 0 : index
    %c0_3 = arith.constant 0 : index
    %c0_4 = arith.constant 0 : index
    %2 = vector.load %arg3[%c0_2, %c0_3, %c0_4] : memref<1x6x16xf32, #tpu.memory_space<vmem>>, vector<1x6x16xf32>
    %3 = vector.shape_cast %2 : vector<1x6x16xf32> to vector<6x16xf32>
    %c0_5 = arith.constant 0 : index
    %c0_6 = arith.constant 0 : index
    %4 = vector.load %arg6[%c0_5, %c0_6] : memref<40x384xf32, #tpu.memory_space<vmem>>, vector<40x384xf32>
    %cst = arith.constant dense<0.000000e+00> : vector<6x384xf32>
    %5 = tpu.matmul %1, %4, %cst {dimension_numbers = #tpu.dot_dimension_numbers<[1], [0], [0], [1], [0, 0, 1, 1], [], []>} : vector<6x40xf32>, vector<40x384xf32>, vector<6x384xf32> -> vector<6x384xf32>
    %c0_7 = arith.constant 0 : index
    %c0_8 = arith.constant 0 : index
    %c0_9 = arith.constant 0 : index
    %6 = vector.load %arg4[%c0_7, %c0_8, %c0_9] : memref<1x1x384xf32, #tpu.memory_space<vmem>>, vector<1x1x384xf32>
    %7 = vector.shape_cast %6 : vector<1x1x384xf32> to vector<1x384xf32>
    %8 = vector.broadcast %7 : vector<1x384xf32> to vector<6x384xf32>
    %9 = arith.addf %5, %8 : vector<6x384xf32>
    %c0_10 = arith.constant 0 : index
    %c0_11 = arith.constant 0 : index
    %10 = vector.load %arg7[%c0_10, %c0_11] : memref<16x384xf32, #tpu.memory_space<vmem>>, vector<16x384xf32>
    %cst_12 = arith.constant dense<0.000000e+00> : vector<6x384xf32>
    %11 = tpu.matmul %3, %10, %cst_12 {dimension_numbers = #tpu.dot_dimension_numbers<[1], [0], [0], [1], [0, 0, 1, 1], [], []>} : vector<6x16xf32>, vector<16x384xf32>, vector<6x384xf32> -> vector<6x384xf32>
    %12 = vector.extract_strided_slice %9 {offsets = [0, 0], sizes = [6, 128], strides = [1, 1]} : vector<6x384xf32> to vector<6x128xf32>
    %13 = vector.extract_strided_slice %11 {offsets = [0, 0], sizes = [6, 128], strides = [1, 1]} : vector<6x384xf32> to vector<6x128xf32>
    %14 = arith.addf %12, %13 : vector<6x128xf32>
    %15 = arith.negf %14 : vector<6x128xf32>
    %16 = math.exp %15 : vector<6x128xf32>
    %cst_13 = arith.constant 1.000000e+00 : f32
    %17 = vector.broadcast %cst_13 : f32 to vector<6x128xf32>
    %18 = arith.addf %17, %16 : vector<6x128xf32>
    %19 = arith.divf %17, %18 : vector<6x128xf32>
    %20 = vector.extract_strided_slice %9 {offsets = [0, 128], sizes = [6, 128], strides = [1, 1]} : vector<6x384xf32> to vector<6x128xf32>
    %21 = vector.extract_strided_slice %11 {offsets = [0, 128], sizes = [6, 128], strides = [1, 1]} : vector<6x384xf32> to vector<6x128xf32>
    %22 = arith.addf %20, %21 : vector<6x128xf32>
    %23 = arith.negf %22 : vector<6x128xf32>
    %24 = math.exp %23 : vector<6x128xf32>
    %cst_14 = arith.constant 1.000000e+00 : f32
    %25 = vector.broadcast %cst_14 : f32 to vector<6x128xf32>
    %26 = arith.addf %25, %24 : vector<6x128xf32>
    %27 = arith.divf %25, %26 : vector<6x128xf32>
    %28 = vector.extract_strided_slice %9 {offsets = [0, 256], sizes = [6, 128], strides = [1, 1]} : vector<6x384xf32> to vector<6x128xf32>
    %29 = vector.extract_strided_slice %11 {offsets = [0, 256], sizes = [6, 128], strides = [1, 1]} : vector<6x384xf32> to vector<6x128xf32>
    %c0_15 = arith.constant 0 : index
    %c0_16 = arith.constant 0 : index
    %30 = vector.load %arg8[%c0_15, %c0_16] : memref<1x128xf32, #tpu.memory_space<vmem>>, vector<1x128xf32>
    %31 = vector.broadcast %30 : vector<1x128xf32> to vector<6x128xf32>
    %32 = arith.addf %29, %31 : vector<6x128xf32>
    %33 = arith.mulf %19, %32 : vector<6x128xf32>
    %34 = arith.addf %28, %33 : vector<6x128xf32>
    %35 = math.tanh %34 : vector<6x128xf32>
    %36 = vector.extract_strided_slice %35 {offsets = [0, 0], sizes = [6, 16], strides = [1, 1]} : vector<6x128xf32> to vector<6x16xf32>
    %37 = vector.extract_strided_slice %27 {offsets = [0, 0], sizes = [6, 16], strides = [1, 1]} : vector<6x128xf32> to vector<6x16xf32>
    %38 = vector.extract_strided_slice %35 {offsets = [0, 0], sizes = [6, 16], strides = [1, 1]} : vector<6x128xf32> to vector<6x16xf32>
    %39 = arith.subf %3, %38 : vector<6x16xf32>
    %40 = arith.mulf %37, %39 : vector<6x16xf32>
    %41 = arith.addf %36, %40 : vector<6x16xf32>
    %c0_17 = arith.constant 0 : index
    %c0_18 = arith.constant 0 : index
    %c0_19 = arith.constant 0 : index
    %42 = vector.load %arg5[%c0_17, %c0_18, %c0_19] : memref<1x6x1xf32, #tpu.memory_space<vmem>>, vector<1x6x1xf32>
    %43 = vector.shape_cast %42 : vector<1x6x1xf32> to vector<6x1xf32>
    %44 = vector.broadcast %43 : vector<6x1xf32> to vector<6x16xf32>
    %45 = arith.mulf %41, %44 : vector<6x16xf32>
    %c0_20 = arith.constant 0 : index
    %c0_21 = arith.constant 0 : index
    %c0_22 = arith.constant 0 : index
    %46 = vector.load %arg9[%c0_20, %c0_21, %c0_22] : memref<1x6x16xf32, #tpu.memory_space<vmem>>, vector<1x6x16xf32>
    %47 = vector.shape_cast %46 : vector<1x6x16xf32> to vector<6x16xf32>
    %48 = vector.shape_cast %45 : vector<6x16xf32> to vector<1x6x16xf32>
    tpu.vector_store %arg9[%c0_20, %c0_21, %c0_22], %48 {strides = array<i32>} : memref<1x6x16xf32, #tpu.memory_space<vmem>>, vector<1x6x16xf32>,
    return
  }
  func.func @transform_0(%arg0: i32, %arg1: i32) -> (i32, i32, i32) {
    %c0_i32 = arith.constant 0 : i32
    %c0_i32_0 = arith.constant 0 : i32
    return %arg0, %arg1, %c0_i32 : i32, i32, i32
  }
  func.func @transform_1(%arg0: i32, %arg1: i32) -> (i32, i32, i32) {
    %c0_i32 = arith.constant 0 : i32
    %c0_i32_0 = arith.constant 0 : i32
    return %arg0, %arg1, %c0_i32 : i32, i32, i32
  }
  func.func @transform_2(%arg0: i32, %arg1: i32) -> (i32, i32, i32) {
    %c0_i32 = arith.constant 0 : i32
    %c0_i32_0 = arith.constant 0 : i32
    %c0_i32_1 = arith.constant 0 : i32
    return %arg0, %c0_i32, %c0_i32_0 : i32, i32, i32
  }
  func.func @transform_3(%arg0: i32, %arg1: i32) -> (i32, i32, i32) {
    %c0_i32 = arith.constant 0 : i32
    %c0_i32_0 = arith.constant 0 : i32
    return %arg0, %arg1, %c0_i32 : i32, i32, i32
  }
  func.func @transform_4(%arg0: i32, %arg1: i32) -> (i32, i32) {
    %c0_i32 = arith.constant 0 : i32
    %c0_i32_0 = arith.constant 0 : i32
    %c0_i32_1 = arith.constant 0 : i32
    return %c0_i32, %c0_i32_0 : i32, i32
  }
  func.func @transform_5(%arg0: i32, %arg1: i32) -> (i32, i32) {
    %c0_i32 = arith.constant 0 : i32
    %c0_i32_0 = arith.constant 0 : i32
    %c0_i32_1 = arith.constant 0 : i32
    return %c0_i32, %c0_i32_0 : i32, i32
  }
  func.func @transform_6(%arg0: i32, %arg1: i32) -> (i32, i32) {
    %c0_i32 = arith.constant 0 : i32
    %c0_i32_0 = arith.constant 0 : i32
    %c0_i32_1 = arith.constant 0 : i32
    return %c0_i32, %c0_i32_0 : i32, i32
  }
  func.func @transform_7(%arg0: i32, %arg1: i32) -> (i32, i32, i32) {
    %c0_i32 = arith.constant 0 : i32
    %c0_i32_0 = arith.constant 0 : i32
    return %arg0, %arg1, %c0_i32 : i32, i32, i32
  }
}

</mosaic_0001>

<bundles_post_ra>
// kernel: tpu_custom_call.1
= control target key start
LH: loop header
LB: loop body
LE: loop exit
PB: predicated region body
PF: predicated region fallthrough
CT: control target
= control target key end

     0   :  { %12 = vsyncpa [#allocation3], 0  ;;  %s1119_s24 = smov 0   ;;  %s1121_s25 = smov 0   ;;  %s1244_s0 = inlined_call_operand.vmem [shape: f32[2,6,40], index: 0, kind: input, shape index: {}]   ;;  %s1245_s1 = inlined_call_operand.vmem [shape: f32[2,6,16], index: 1, kind: input, shape index: {}]   ;;  %s1246_s2 = inlined_call_operand.vmem [shape: f32[2,1,384], index: 2, kind: input, shape index: {}]   ;;  %s1247_s3 = inlined_call_operand.vmem [shape: f32[2,6,1], index: 3, kind: input, shape index: {}]   ;;  %s1248_s4 = inlined_call_operand.hbm [shape: f32[40,384], index: 4, kind: input, shape index: {}]   ;;  %s1249_s5 = inlined_call_operand.vmem [shape: f32[16,384], index: 5, kind: input, shape index: {}]   ;;  %s1250_s6 = inlined_call_operand.vmem [shape: f32[1,128], index: 6, kind: input, shape index: {}]   ;;  %s1251_s7 = inlined_call_operand.vmem [shape: f32[2,6,16], index: 7, kind: output, shape index: {}]  }
   0x1   :  { %s1123_s26 = smov 0  }
   0x2 LB: > { %s889_s27 = sadd.s32 4294967295, %s1070_s26   ;;  %s30_s28 = sadd.s32 1, %s1066_s25  ;;  %s1070_s26 = sphi %s1123_s26, %s18_s26   ;;  %s1066_s25 = sphi %s1121_s25, %s1261_s25   ;;  %s1062_s24 = sphi %s1119_s24, %s1260_s24  }
   0x3   : > { %p32_p0 = scmp.ge.s32.totalorder %s30_s28, 2  ;;  %p891_p1 = scmp.ge.s32.totalorder %s1070_s26, 1 }
   0x4   : > { %p236_p2 = scmp.lt.s32.totalorder %s1070_s26, 3  ;;  %p1144_p4 = scmp.eq.s32.totalorder %s889_s27, 0 }
   0x5   : > { %s1263_s28 = smov (%p32_p0, %s30_s28), 0  ;;  %s1072_s8 = smov [#allocation2]  }
   0x6   : > { %p1140_p3 = pnand %p891_p1, %p236_p2  ;;  %s248_s9 = sshll.u32 %s1072_s8, 4  ;;  %s249_s9 = int_to_ptr.vmem [resolvable:$true] %s248_s9 }
   0x7   : > { %s1256_s30 = scalar_select %p1144_p4, 1, 0 }
   0x8   : > { %s1255_s29 = scalar_select %p1140_p3, 1, 0 }
   0x9   : > { %p968_p5 = pneg %p1140_p3  ;;  %s1016_s13 = scalar_lea.hbm %s1248_s4, 1920 }
   0xa   : > { %p1017_p7 = scmp.ne.s32.totalorder %s1248_s4, %s1016_s13  ;;  %p1023_p11 = scmp.lt.u32.totalorder %s1016_s13, %s1248_s4 }
   0xb   : > { %p1152_p6 = pnand %p1144_p4, %p968_p5 }
   0xd   : > { %p1018_p8 = pneg %p1152_p6 }
   0xf   : > { %p1019_p9 = pnand %p1018_p8, %p1017_p7 }
  0x11   : > { %p1020_p10 = pneg %p1019_p9 }
  0x13   : > { %p1025_p12 = pnand %p1023_p11, %p1020_p10 }
  0x15   : > { %1028 = shalt.err (!%p1025_p12)
}
  0x16   : > { %s1029_s18 = scalar_lea.vmem %s249_s9, 1920  ;;  %p1037_p2 = scmp.lt.s32.totalorder %s249_s9, %s249_s9 }
  0x17   : > { %p1030_p13 = scmp.ne.s32.totalorder %s249_s9, %s1029_s18  ;;  %p1038_p5 = scmp.lt.s32.totalorder %s1029_s18, %s1029_s18 }
  0x19   : > { %p1032_p0 = pnand %p1030_p13, %p1018_p8  ;;  %p1039_p4 = por %p1038_p5, %p1037_p2 }
  0x1b   : > { %p1033_p1 = pneg %p1032_p0 }
  0x1d   : > { %p1040_p3 = pnand %p1039_p4, %p1033_p1 }
  0x1f   : > { %1043 = shalt.err (!%p1040_p3)
}
  0x20   : > { %s1073_s19 = smov 384   ;;  %s1074_s20 = smov 24  }
  0x21   : > { %971 = dma.hbm_to_vmem [thread:$0]  (!%p1152_p6), %s1248_s4, 1920, %s249_s9, [#allocation3], %s1073_s19, %s1073_s19, %s1074_s20  }
  0x22   : > { %p1258_p7 = scmp.ne.s32.totalorder %s1255_s29, 0 }
  0x23   : > { %p1259_p9 = scmp.ne.s32.totalorder (!%p1258_p7), %s1256_s30, 0 }
  0x24   : > { %307 = sbr.rel (%p1258_p7) target bundleno = 330 (0x14a), region = 48 }
  0x2b   : > { %1057 = dma.done.wait (%p1259_p9), [#allocation3], 1920  }
  0x2c   : > { %1059 = vsyncadd (%p1259_p9), [#allocation3], 4294965376  ;;  %v1075_v0 = vmov 0.0   ;;  %p361_p3 = scmp.lt.s32.totalorder %s1062_s24, 1  ;;  %v1076_v1 = vmov 0.0|0.0   ;;  %vm1077_vm0 = vmmov 0   ;;  %v412_v36 = vlaneseq }
  0x2d   : > { %495 = vmatprep.mubr.f32.mxu0 %v1075_v0  ;;  %946 = vmatprep.subr.bf16.mxu1 %v1076_v1  ;;  %v1078_v2 = vmov 0   ;;  %v396_v3 = vld [vmem:[#allocation2 + $0x8] sm:$0xff]  ;;  %v399_v4 = vld [vmem:[#allocation2 + $0x20] sm:$0xff]  ;;  %v398_v7 = vld [vmem:[#allocation2 + $0x18] sm:$0xff]  ;;  %vm427_vm1 = vcmask 326656   ;;  %vm578_vm2 = vcmask 130048  }
  0x2e   : > { %928 = vmatprep.mubr.msk.f32.mxu1 %vm1077_vm0, %v1075_v0  ;;  %1005 = vset.pattern.permute.xlu0 %v1078_v2  ;;  %s1265_s24 = smov (!%p361_p3, %s1062_s24), 1  ;;  %v395_v5 = vld [vmem:[#allocation2] sm:$0xff]  ;;  %v938_v6 = vpack.c.bf16 %v399_v4, %v396_v3  ;;  %v402_v8 = vld [vmem:[#allocation2 + $0x38] sm:$0xff]  ;;  %v405_v9 = vld [vmem:[#allocation2 + $0x50] sm:$0xff]  ;;  %v413_v37 = vshrl.u32 %v412_v36, 7  ;;  %vm758_vm3 = vcmask 128000  }
  0x2f   : > { %v940_v10 = vpack.c.bf16 %v398_v7, %v395_v5  ;;  %v942_v11 = vpack.c.bf16 %v405_v9, %v402_v8  ;;  %v401_v12 = vld [vmem:[#allocation2 + $0x30] sm:$0xff]  ;;  %v404_v13 = vld [vmem:[#allocation2 + $0x48] sm:$0xff]  ;;  %s1186_s23 = sshll.u32 %s1265_s24, 3  ;;  %v576_v19 = vld [vmem:[%s1249_s5 + $0x20] sm:$0xff]  ;;  %s963_s8 = smul.u32 3, %s1265_s24 }
  0x30   : > { %939 = vmatprep.subr.bf16.mxu0 %v938_v6  ;;  %v944_v14 = vpack.c.bf16 %v404_v13, %v401_v12  ;;  %v408_v15 = vld [vmem:[#allocation2 + $0x68] sm:$0xff]  ;;  %s385_s30 = scalar_lea.vmem %s1247_s3, %s1186_s23  ;;  %v397_v17 = vld [vmem:[#allocation2 + $0x10] sm:$0xff]  ;;  %v403_v21 = vld [vmem:[#allocation2 + $0x40] sm:$0xff]  ;;  %s367_s14 = scalar_lea.vmem %s1244_s0, %s1186_s23  ;;  %v422_v38 = vsub.s32 2, %v413_v37  ;;  %v414_v40 = vsub.s32 0, %v413_v37  ;;  %v418_v42 = vsub.s32 1, %v413_v37 }
  0x31   : > { %941 = vmatpush1.bf16.msra.mxu0 %v940_v10  ;;  %v573_v16 = vld [vmem:[%s1249_s5 + $0x8] sm:$0xff]  ;;  %v406_v22 = vld [vmem:[#allocation2 + $0x58] sm:$0xff]  ;;  %v572_v23 = vld [vmem:[%s1249_s5] sm:$0xff]  ;;  %s378_s11 = scalar_lea.vmem %s1246_s2, %s963_s8  ;;  %s392_s15 = scalar_lea.vmem %s1251_s7, %s1186_s23 }
  0x32   : > { %943 = vmatprep.subr.bf16.mxu0 %v942_v11  ;;  %v400_v18 = vld [vmem:[#allocation2 + $0x28] sm:$0xff]  ;;  %v575_v24 = vld [vmem:[%s1249_s5 + $0x18] sm:$0xff]  ;;  %v751_v25 = vld [vmem:[%s385_s30] sm:$0x3f]  ;;  %v950_v26 = vpack.c.bf16 %v406_v22, %v403_v21  ;;  %v952_v28 = vpack.c.bf16 %v576_v19, %v573_v16  ;;  %s374_s30 = scalar_lea.vmem %s1245_s1, %s1186_s23 }
  0x33   : > { %v947_v20 = vpack.c.bf16 %v400_v18, %v397_v17  ;;  %v407_v27 = vld [vmem:[#allocation2 + $0x60] sm:$0xff]  ;;  %v954_v30 = vpack.c.bf16 %v575_v24, %v572_v23  ;;  %754 = vperm.xlu0 %1005, %v751_v25   ;;  %v574_v31 = vld [vmem:[%s1249_s5 + $0x10] sm:$0xff]  ;;  %v577_v32 = vld [vmem:[%s1249_s5 + $0x28] sm:$0xff] }
  0x34   : > { %v393_v29 = vld [vmem:[%s367_s14] sm:$0x3f]  ;;  %v409_v33 = vld [vmem:[#allocation2 + $0x70] sm:$0xff]  ;;  %v957_v34 = vpack.c.bf16 %v577_v32, %v574_v31 }
  0x35   : > { %945 = vmatpush1.bf16.msra.mxu0 %v944_v14  ;;  %948 = vmatpush3.bf16.msra.mxu1 %v947_v20  ;;  %v394_v35 = vld [vmem:[%s374_s30] sm:$0x3f] }
  0x36   : > { %439 = vmatprep.subr.mxu0 %v408_v15  ;;  %949 = vmatprep.subr.bf16.mxu1 %v1076_v1  ;;  %v410_v39 = vld [vmem:[%s378_s11] sm:$0x7] }
  0x37   : > { %v423_v41 = vrot.slane %v410_v39, %v422_v38  ;;  %v415_v44 = vrot.slane %v410_v39, %v414_v40  ;;  %v419_v47 = vrot.slane %v410_v39, %v418_v42  ;;  %v906_v58 = vld [vmem:[%s1250_s6] ss:$0 sm:$0xff] }
  0x39   : > { %440 = vmatpush1.msra.mxu0 %v407_v27  ;;  %951 = vmatpush3.bf16.msra.mxu1 %v950_v26 }
  0x3a   : > { %900 = vmatmul.mubr.msk.f32.vlgmr.msra.gmra.mrb[0].mxu0 %vm427_vm1, %v393_v29  ;;  %953 = vmatprep.subr.bf16.mxu0 %v952_v28 }
  0x3b   : > { %955 = vmatpush1.bf16.msra.mxu0 %v954_v30  ;;  %646 = vmatprep.mubr.f32.mxu0 %v1075_v0 }
  0x3c   : > { %926 = vmatprep.subr.mxu1 %v1075_v0 }
  0x3d   : > { %927 = vmatpush3.msra.mxu1 %v409_v33 }
  0x3e   : > { %929 = vmatmul.mubr.msk.f32.vlgmr.msra.gmra.mrb[0].mxu1 %vm427_vm1, %v393_v29  ;;  %956 = vmatprep.subr.bf16.mxu1 %v1076_v1 }
  0x3f   : > { %958 = vmatpush3.bf16.msra.mxu1 %v957_v34  ;;  %935 = vmatprep.mubr.msk.f32.mxu1 %vm1077_vm0, %v1075_v0 }
  0x42   : > { %902 = vmatmul.mubr.msk.f32.vlgmr.msra.gmra.mrb[0].mxu0 %vm578_vm2, %v394_v35  ;;  %936 = vmatmul.mubr.msk.f32.vlgmr.msra.gmra.mrb[2].mxu1 %vm578_vm2, %v394_v35 }
  0xb2   : > { %v755_v5 = vpop.permute.xlu0 %754 }
 0x111   : > { %v568_v43 = vpop.f32.mrb[0].mxu1 }
 0x112   : > { %v569_v45 = vadd.f32 %v568_v43, %v423_v41  ;;  %v930_v46 = vpop.f32.mrb[1].mxu1 }
 0x115   : > { %v648_v48 = vpop.f32.mrb[0].mxu0  ;;  %v719_v49 = vpop.f32.mrb[2].mxu1 }
 0x116   : > { %v959_v50 = vadd.f32 %v648_v48, %v415_v44  ;;  %v650_v51 = vpop.f32.mrb[1].mxu0  ;;  %v937_v52 = vpop.f32.mrb[3].mxu1  ;;  %v744_v59 = vadd.f32 %v906_v58, %v719_v49 }
 0x117   : > { %v960_v53 = vadd.f32 %v650_v51, %v419_v47 }
 0x118   : > { %v904_v54 = vmul.f32 -1.442695, %v959_v50 }
 0x119   : > { %v905_v55 = vmul.f32 -1.442695, %v960_v53 }
 0x11a   : > { %1006 = vpow2.f32 %v904_v54 }
 0x11b   : > { %1008 = vpow2.f32 %v905_v55 }
 0x124   : > { %v1007_v56 = vpop.eup %1006 }
 0x125   : > { %v727_v57 = vadd.f32 1.0, %v1007_v56  ;;  %v1009_v60 = vpop.eup %1008 }
 0x126   : > { %v734_v63 = vadd.f32 1.0, %v1009_v60 }
 0x127   : > { %1010 = vrcp.f32 %v727_v57 }
 0x131   : > { %v1011_v61 = vpop.eup %1010 }
 0x132   : > { %v745_v62 = vmul.f32 %v1011_v61, %v744_v59 }
 0x134   : > { %v746_v0 = vadd.f32 %v745_v62, %v569_v45 }
 0x136   : > { %1012 = vtanh.f32 %v746_v0 }
 0x137   : > { %1014 = vrcp.f32 %v734_v63 }
 0x140   : > { %v1013_v1 = vpop.eup %1012 }
 0x141   : > { %v748_v2 = vsub.f32 %v394_v35, %v1013_v1  ;;  %v1015_v3 = vpop.eup %1014 }
 0x143   : > { %v749_v4 = vmul.f32 %v1015_v3, %v748_v2 }
 0x145   : > { %v750_v6 = vadd.f32 %v1013_v1, %v749_v4 }
 0x147   : > { %v757_v7 = vmul.f32 %v755_v5, %v750_v6 }
 0x149   : > { %759 = vst.msk [vmem:[%s392_s15] sm:$0x3f] %vm758_vm3, %v757_v7 }
 0x14a PF: > { %s18_s26 = sadd.s32 1, %s1070_s26   ;;  %s1260_s24 = smov %s1066_s25 }
 0x14b   : > { %p15_p4 = scmp.ge.s32.totalorder %s18_s26, 4   ;;  %s1261_s25 = smov %s1263_s28 }
 0x14d   :  { %17 = sbr.rel (!%p15_p4) target bundleno = 2 (0x2), region = 92 }
 0x154   :  { %785 = vsyncpa [#allocation3], 1 }
 0x155   :  { %787 = vsyncpa [#allocation3 + $0x1], 1 }

// kernel: tpu_custom_call.1
= control target key start
LH: loop header
LB: loop body
LE: loop exit
PB: predicated region body
PF: predicated region fallthrough
CT: control target
= control target key end

     0   :  { %12 = vsyncpa [#allocation3], 0  ;;  %s1119_s24 = smov 0   ;;  %s1121_s25 = smov 0   ;;  %s1244_s0 = inlined_call_operand.vmem [shape: f32[2,6,40], index: 0, kind: input, shape index: {}]   ;;  %s1245_s1 = inlined_call_operand.vmem [shape: f32[2,6,16], index: 1, kind: input, shape index: {}]   ;;  %s1246_s2 = inlined_call_operand.vmem [shape: f32[2,1,384], index: 2, kind: input, shape index: {}]   ;;  %s1247_s3 = inlined_call_operand.vmem [shape: f32[2,6,1], index: 3, kind: input, shape index: {}]   ;;  %s1248_s4 = inlined_call_operand.hbm [shape: f32[40,384], index: 4, kind: input, shape index: {}]   ;;  %s1249_s5 = inlined_call_operand.vmem [shape: f32[16,384], index: 5, kind: input, shape index: {}]   ;;  %s1250_s6 = inlined_call_operand.vmem [shape: f32[1,128], index: 6, kind: input, shape index: {}]   ;;  %s1251_s7 = inlined_call_operand.vmem [shape: f32[2,6,16], index: 7, kind: output, shape index: {}]  }
   0x1   :  { %s1123_s26 = smov 0  }
   0x2 LB: > { %s889_s27 = sadd.s32 4294967295, %s1070_s26   ;;  %s30_s28 = sadd.s32 1, %s1066_s25  ;;  %s1070_s26 = sphi %s1123_s26, %s18_s26   ;;  %s1066_s25 = sphi %s1121_s25, %s1261_s25   ;;  %s1062_s24 = sphi %s1119_s24, %s1260_s24  }
   0x3   : > { %p32_p0 = scmp.ge.s32.totalorder %s30_s28, 2  ;;  %p891_p1 = scmp.ge.s32.totalorder %s1070_s26, 1 }
   0x4   : > { %p236_p2 = scmp.lt.s32.totalorder %s1070_s26, 3  ;;  %p1144_p4 = scmp.eq.s32.totalorder %s889_s27, 0 }
   0x5   : > { %s1263_s28 = smov (%p32_p0, %s30_s28), 0  ;;  %s1072_s8 = smov [#allocation2]  }
   0x6   : > { %p1140_p3 = pnand %p891_p1, %p236_p2  ;;  %s248_s9 = sshll.u32 %s1072_s8, 4  ;;  %s249_s9 = int_to_ptr.vmem [resolvable:$true] %s248_s9 }
   0x7   : > { %s1256_s30 = scalar_select %p1144_p4, 1, 0 }
   0x8   : > { %s1255_s29 = scalar_select %p1140_p3, 1, 0 }
   0x9   : > { %p968_p5 = pneg %p1140_p3  ;;  %s1016_s13 = scalar_lea.hbm %s1248_s4, 1920 }
   0xa   : > { %p1017_p7 = scmp.ne.s32.totalorder %s1248_s4, %s1016_s13  ;;  %p1023_p11 = scmp.lt.u32.totalorder %s1016_s13, %s1248_s4 }
   0xb   : > { %p1152_p6 = pnand %p1144_p4, %p968_p5 }
   0xd   : > { %p1018_p8 = pneg %p1152_p6 }
   0xf   : > { %p1019_p9 = pnand %p1018_p8, %p1017_p7 }
  0x11   : > { %p1020_p10 = pneg %p1019_p9 }
  0x13   : > { %p1025_p12 = pnand %p1023_p11, %p1020_p10 }
  0x15   : > { %1028 = shalt.err (!%p1025_p12)
}
  0x16   : > { %s1029_s18 = scalar_lea.vmem %s249_s9, 1920  ;;  %p1037_p2 = scmp.lt.s32.totalorder %s249_s9, %s249_s9 }
  0x17   : > { %p1030_p13 = scmp.ne.s32.totalorder %s249_s9, %s1029_s18  ;;  %p1038_p5 = scmp.lt.s32.totalorder %s1029_s18, %s1029_s18 }
  0x19   : > { %p1032_p0 = pnand %p1030_p13, %p1018_p8  ;;  %p1039_p4 = por %p1038_p5, %p1037_p2 }
  0x1b   : > { %p1033_p1 = pneg %p1032_p0 }
  0x1d   : > { %p1040_p3 = pnand %p1039_p4, %p1033_p1 }
  0x1f   : > { %1043 = shalt.err (!%p1040_p3)
}
  0x20   : > { %s1073_s19 = smov 384   ;;  %s1074_s20 = smov 24  }
  0x21   : > { %971 = dma.hbm_to_vmem [thread:$0]  (!%p1152_p6), %s1248_s4, 1920, %s249_s9, [#allocation3], %s1073_s19, %s1073_s19, %s1074_s20  }
  0x22   : > { %p1258_p7 = scmp.ne.s32.totalorder %s1255_s29, 0 }
  0x23   : > { %p1259_p9 = scmp.ne.s32.totalorder (!%p1258_p7), %s1256_s30, 0 }
  0x24   : > { %307 = sbr.rel (%p1258_p7) target bundleno = 330 (0x14a), region = 48 }
  0x2b   : > { %1057 = dma.done.wait (%p1259_p9), [#allocation3], 1920  }
  0x2c   : > { %1059 = vsyncadd (%p1259_p9), [#allocation3], 4294965376  ;;  %v1075_v0 = vmov 0.0   ;;  %p361_p3 = scmp.lt.s32.totalorder %s1062_s24, 1  ;;  %v1076_v1 = vmov 0.0|0.0   ;;  %vm1077_vm0 = vmmov 0   ;;  %v412_v36 = vlaneseq }
  0x2d   : > { %495 = vmatprep.mubr.f32.mxu0 %v1075_v0  ;;  %946 = vmatprep.subr.bf16.mxu1 %v1076_v1  ;;  %v1078_v2 = vmov 0   ;;  %v396_v3 = vld [vmem:[#allocation2 + $0x8] sm:$0xff]  ;;  %v399_v4 = vld [vmem:[#allocation2 + $0x20] sm:$0xff]  ;;  %v398_v7 = vld [vmem:[#allocation2 + $0x18] sm:$0xff]  ;;  %vm427_vm1 = vcmask 326656   ;;  %vm578_vm2 = vcmask 130048  }
  0x2e   : > { %928 = vmatprep.mubr.msk.f32.mxu1 %vm1077_vm0, %v1075_v0  ;;  %1005 = vset.pattern.permute.xlu0 %v1078_v2  ;;  %s1265_s24 = smov (!%p361_p3, %s1062_s24), 1  ;;  %v395_v5 = vld [vmem:[#allocation2] sm:$0xff]  ;;  %v938_v6 = vpack.c.bf16 %v399_v4, %v396_v3  ;;  %v402_v8 = vld [vmem:[#allocation2 + $0x38] sm:$0xff]  ;;  %v405_v9 = vld [vmem:[#allocation2 + $0x50] sm:$0xff]  ;;  %v413_v37 = vshrl.u32 %v412_v36, 7  ;;  %vm758_vm3 = vcmask 128000  }
  0x2f   : > { %v940_v10 = vpack.c.bf16 %v398_v7, %v395_v5  ;;  %v942_v11 = vpack.c.bf16 %v405_v9, %v402_v8  ;;  %v401_v12 = vld [vmem:[#allocation2 + $0x30] sm:$0xff]  ;;  %v404_v13 = vld [vmem:[#allocation2 + $0x48] sm:$0xff]  ;;  %s1186_s23 = sshll.u32 %s1265_s24, 3  ;;  %v576_v19 = vld [vmem:[%s1249_s5 + $0x20] sm:$0xff]  ;;  %s963_s8 = smul.u32 3, %s1265_s24 }
  0x30   : > { %939 = vmatprep.subr.bf16.mxu0 %v938_v6  ;;  %v944_v14 = vpack.c.bf16 %v404_v13, %v401_v12  ;;  %v408_v15 = vld [vmem:[#allocation2 + $0x68] sm:$0xff]  ;;  %s385_s30 = scalar_lea.vmem %s1247_s3, %s1186_s23  ;;  %v397_v17 = vld [vmem:[#allocation2 + $0x10] sm:$0xff]  ;;  %v403_v21 = vld [vmem:[#allocation2 + $0x40] sm:$0xff]  ;;  %s367_s14 = scalar_lea.vmem %s1244_s0, %s1186_s23  ;;  %v422_v38 = vsub.s32 2, %v413_v37  ;;  %v414_v40 = vsub.s32 0, %v413_v37  ;;  %v418_v42 = vsub.s32 1, %v413_v37 }
  0x31   : > { %941 = vmatpush1.bf16.msra.mxu0 %v940_v10  ;;  %v573_v16 = vld [vmem:[%s1249_s5 + $0x8] sm:$0xff]  ;;  %v406_v22 = vld [vmem:[#allocation2 + $0x58] sm:$0xff]  ;;  %v572_v23 = vld [vmem:[%s1249_s5] sm:$0xff]  ;;  %s378_s11 = scalar_lea.vmem %s1246_s2, %s963_s8  ;;  %s392_s15 = scalar_lea.vmem %s1251_s7, %s1186_s23 }
  0x32   : > { %943 = vmatprep.subr.bf16.mxu0 %v942_v11  ;;  %v400_v18 = vld [vmem:[#allocation2 + $0x28] sm:$0xff]  ;;  %v575_v24 = vld [vmem:[%s1249_s5 + $0x18] sm:$0xff]  ;;  %v751_v25 = vld [vmem:[%s385_s30] sm:$0x3f]  ;;  %v950_v26 = vpack.c.bf16 %v406_v22, %v403_v21  ;;  %v952_v28 = vpack.c.bf16 %v576_v19, %v573_v16  ;;  %s374_s30 = scalar_lea.vmem %s1245_s1, %s1186_s23 }
  0x33   : > { %v947_v20 = vpack.c.bf16 %v400_v18, %v397_v17  ;;  %v407_v27 = vld [vmem:[#allocation2 + $0x60] sm:$0xff]  ;;  %v954_v30 = vpack.c.bf16 %v575_v24, %v572_v23  ;;  %754 = vperm.xlu0 %1005, %v751_v25   ;;  %v574_v31 = vld [vmem:[%s1249_s5 + $0x10] sm:$0xff]  ;;  %v577_v32 = vld [vmem:[%s1249_s5 + $0x28] sm:$0xff] }
  0x34   : > { %v393_v29 = vld [vmem:[%s367_s14] sm:$0x3f]  ;;  %v409_v33 = vld [vmem:[#allocation2 + $0x70] sm:$0xff]  ;;  %v957_v34 = vpack.c.bf16 %v577_v32, %v574_v31 }
  0x35   : > { %945 = vmatpush1.bf16.msra.mxu0 %v944_v14  ;;  %948 = vmatpush3.bf16.msra.mxu1 %v947_v20  ;;  %v394_v35 = vld [vmem:[%s374_s30] sm:$0x3f] }
  0x36   : > { %439 = vmatprep.subr.mxu0 %v408_v15  ;;  %949 = vmatprep.subr.bf16.mxu1 %v1076_v1  ;;  %v410_v39 = vld [vmem:[%s378_s11] sm:$0x7] }
  0x37   : > { %v423_v41 = vrot.slane %v410_v39, %v422_v38  ;;  %v415_v44 = vrot.slane %v410_v39, %v414_v40  ;;  %v419_v47 = vrot.slane %v410_v39, %v418_v42  ;;  %v906_v58 = vld [vmem:[%s1250_s6] ss:$0 sm:$0xff] }
  0x39   : > { %440 = vmatpush1.msra.mxu0 %v407_v27  ;;  %951 = vmatpush3.bf16.msra.mxu1 %v950_v26 }
  0x3a   : > { %900 = vmatmul.mubr.msk.f32.vlgmr.msra.gmra.mrb[0].mxu0 %vm427_vm1, %v393_v29  ;;  %953 = vmatprep.subr.bf16.mxu0 %v952_v28 }
  0x3b   : > { %955 = vmatpush1.bf16.msra.mxu0 %v954_v30  ;;  %646 = vmatprep.mubr.f32.mxu0 %v1075_v0 }
  0x3c   : > { %926 = vmatprep.subr.mxu1 %v1075_v0 }
  0x3d   : > { %927 = vmatpush3.msra.mxu1 %v409_v33 }
  0x3e   : > { %929 = vmatmul.mubr.msk.f32.vlgmr.msra.gmra.mrb[0].mxu1 %vm427_vm1, %v393_v29  ;;  %956 = vmatprep.subr.bf16.mxu1 %v1076_v1 }
  0x3f   : > { %958 = vmatpush3.bf16.msra.mxu1 %v957_v34  ;;  %935 = vmatprep.mubr.msk.f32.mxu1 %vm1077_vm0, %v1075_v0 }
  0x42   : > { %902 = vmatmul.mubr.msk.f32.vlgmr.msra.gmra.mrb[0].mxu0 %vm578_vm2, %v394_v35  ;;  %936 = vmatmul.mubr.msk.f32.vlgmr.msra.gmra.mrb[2].mxu1 %vm578_vm2, %v394_v35 }
  0xb2   : > { %v755_v5 = vpop.permute.xlu0 %754 }
 0x111   : > { %v568_v43 = vpop.f32.mrb[0].mxu1 }
 0x112   : > { %v569_v45 = vadd.f32 %v568_v43, %v423_v41  ;;  %v930_v46 = vpop.f32.mrb[1].mxu1 }
 0x115   : > { %v648_v48 = vpop.f32.mrb[0].mxu0  ;;  %v719_v49 = vpop.f32.mrb[2].mxu1 }
 0x116   : > { %v959_v50 = vadd.f32 %v648_v48, %v415_v44  ;;  %v650_v51 = vpop.f32.mrb[1].mxu0  ;;  %v937_v52 = vpop.f32.mrb[3].mxu1  ;;  %v744_v59 = vadd.f32 %v906_v58, %v719_v49 }
 0x117   : > { %v960_v53 = vadd.f32 %v650_v51, %v419_v47 }
 0x118   : > { %v904_v54 = vmul.f32 -1.442695, %v959_v50 }
 0x119   : > { %v905_v55 = vmul.f32 -1.442695, %v960_v53 }
 0x11a   : > { %1006 = vpow2.f32 %v904_v54 }
 0x11b   : > { %1008 = vpow2.f32 %v905_v55 }
 0x124   : > { %v1007_v56 = vpop.eup %1006 }
 0x125   : > { %v727_v57 = vadd.f32 1.0, %v1007_v56  ;;  %v1009_v60 = vpop.eup %1008 }
 0x126   : > { %v734_v63 = vadd.f32 1.0, %v1009_v60 }
 0x127   : > { %1010 = vrcp.f32 %v727_v57 }
 0x131   : > { %v1011_v61 = vpop.eup %1010 }
 0x132   : > { %v745_v62 = vmul.f32 %v1011_v61, %v744_v59 }
 0x134   : > { %v746_v0 = vadd.f32 %v745_v62, %v569_v45 }
 0x136   : > { %1012 = vtanh.f32 %v746_v0 }
 0x137   : > { %1014 = vrcp.f32 %v734_v63 }
 0x140   : > { %v1013_v1 = vpop.eup %1012 }
 0x141   : > { %v748_v2 = vsub.f32 %v394_v35, %v1013_v1  ;;  %v1015_v3 = vpop.eup %1014 }
 0x143   : > { %v749_v4 = vmul.f32 %v1015_v3, %v748_v2 }
 0x145   : > { %v750_v6 = vadd.f32 %v1013_v1, %v749_v4 }
 0x147   : > { %v757_v7 = vmul.f32 %v755_v5, %v750_v6 }
 0x149   : > { %759 = vst.msk [vmem:[%s392_s15] sm:$0x3f] %vm758_vm3, %v757_v7 }
 0x14a PF: > { %s18_s26 = sadd.s32 1, %s1070_s26   ;;  %s1260_s24 = smov %s1066_s25 }
 0x14b   : > { %p15_p4 = scmp.ge.s32.totalorder %s18_s26, 4   ;;  %s1261_s25 = smov %s1263_s28 }
 0x14d   :  { %17 = sbr.rel (!%p15_p4) target bundleno = 2 (0x2), region = 92 }
 0x154   :  { %785 = vsyncpa [#allocation3], 1 }
 0x155   :  { %787 = vsyncpa [#allocation3 + $0x1], 1 }

</bundles_post_ra>
